<compile_context>
chip_gen: v6e
topology: v6e:2x2x1
jax: 0.10.0
libtpu: 0.0.40
codegen_flags: <defaults>
</compile_context>

<pallas_src>
import functools

import jax
import jax.numpy as jnp
from jax.experimental import pallas as pl
from jax.experimental.pallas import tpu as pltpu


def se_block_kernel(x_ref, w1t_ref, b1_ref, w2t_ref, b2_ref, o_ref, *,
                    spatial_axis):
    """Fused SE forward for one (bt, ...) block.

    Layouts (selected by spatial_axis):
      spatial_axis=2: x_ref/o_ref = (bt, C, HW)   channels on sublanes
      spatial_axis=1: x_ref/o_ref = (bt, HW, C)   channels on lanes
    w1t_ref: (C, Cr); b1_ref: (1, Cr); w2t_ref: (Cr, C); b2_ref: (1, C).
    """
    x = x_ref[...]
    hw = x.shape[spatial_axis]

    # Global average pool over the spatial axis, accumulated in f32: (bt, C).
    pooled = jnp.sum(x.astype(jnp.float32), axis=spatial_axis) * (1.0 / hw)

    # cSE MLP, batched across the whole batch tile (2 matmuls, not 2*bt matvecs).
    h = jnp.dot(pooled, w1t_ref[...],
                preferred_element_type=jnp.float32) + b1_ref[...]
    h = jnp.maximum(h, 0.0)                                          # (bt, Cr)
    s = jnp.dot(h, w2t_ref[...],
                preferred_element_type=jnp.float32) + b2_ref[...]
    s = jax.nn.sigmoid(s)                                            # (bt, C)

    # Channel-wise rescale in the input dtype (keeps bf16 slabs in bf16).
    scale = jnp.expand_dims(s, axis=spatial_axis).astype(x.dtype)
    o_ref[...] = (x * scale).astype(o_ref.dtype)


def _vmem_capacity_bytes(default=64 << 20):
    """Physical VMEM per TensorCore; conservative (v7x) default if unknown."""
    get_info = getattr(pltpu, "get_tpu_info", None)
    if get_info is None:
        return default
    try:
        return int(getattr(get_info(), "vmem_capacity_bytes", default))
    except Exception:
        return default


def _budgets(target_block_bytes, vmem_limit_bytes):
    """Per-generation (block budget, scoped VMEM limit, physical VMEM)."""
    vmem_cap = _vmem_capacity_bytes()
    if vmem_cap > (64 << 20):
        # v5e / v6e: 128 MiB VMEM -> bigger blocks, generous scoped limit.
        tb_def, vl_def = 16 << 20, 96 << 20
    else:
        # v7x (or unknown): 64 MiB per TC -> keep 4x block + scratch under it.
        tb_def, vl_def = 6 << 20, 44 << 20
    return (target_block_bytes if target_block_bytes is not None else tb_def,
            vmem_limit_bytes if vmem_limit_bytes is not None else vl_def,
            vmem_cap)


def _pick_batch_tile(batch, per_image_bytes, target_block_bytes):
    """Largest divisor of `batch` whose block fits the budget, preferring an
    even (>=2) number of grid steps so v7x's 2 TensorCores split evenly."""
    divisors = [d for d in range(1, batch + 1) if batch % d == 0]
    fitting = [d for d in divisors if d * per_image_bytes <= target_block_bytes]
    if not fitting:
        # A single image already exceeds the block budget; fall back to bt=1.
        return 1
    even = [d for d in fitting if (batch // d) >= 2 and (batch // d) % 2 == 0]
    atleast2 = [d for d in fitting if (batch // d) >= 2]
    pool = even or atleast2 or fitting
    return max(pool)


def se_block(x, w1, b1, w2, b2, *, target_block_bytes=None,
             vmem_limit_bytes=None, channels_on_lanes=None):
    """SEBlock forward. x: (B,C,H,W) NCHW; w1: (Cr,C); b1: (Cr,);
    w2: (C,Cr); b2: (C,)."""
    B, C, H, W = x.shape
    Cr = w1.shape[0]
    HW = H * W

    tb, vl, vmem_cap = _budgets(target_block_bytes, vmem_limit_bytes)

    if channels_on_lanes is None:
        # Put a 128-multiple on the lane (last) axis when possible; typical SE
        # stages (7x7/14x14 maps with C % 128 == 0) take the lane path.
        channels_on_lanes = (HW % 128 != 0) and (C % 128 == 0)

    if channels_on_lanes:
        # Channels dense on lanes. From NCHW this costs an XLA transpose pass
        # each way; feed NHWC activations in a real network to avoid it.
        x2 = jnp.transpose(x.reshape(B, C, HW), (0, 2, 1))       # (B, HW, C)
        spatial_axis = 1
        block_of = lambda bt: (bt, HW, C)
    else:
        x2 = x.reshape(B, C, HW)                                 # (B, C, HW)
        spatial_axis = 2
        block_of = lambda bt: (bt, C, HW)

    # Right-multiplied batched MLP: pass W^T so pooled/h/s keep channels on
    # the lane axis inside the kernel (transposes are free, wrapper-side).
    w1t = w1.T                      # (C, Cr)
    w2t = w2.T                      # (Cr, C)
    b1r = b1.reshape(1, Cr)
    b2r = b2.reshape(1, C)

    per_image_bytes = C * HW * x.dtype.itemsize
    bt = _pick_batch_tile(B, per_image_bytes, tb)
    block_bytes = bt * per_image_bytes

    # Scoped VMEM must cover double-buffered in+out blocks plus the resident
    # weights; never request more than physical VMEM.
    weight_bytes = (2 * C * Cr + C + Cr) * w1.dtype.itemsize
    needed = 4 * block_bytes + 4 * weight_bytes + (2 << 20)
    vl = int(min(max(vl, needed), vmem_cap))
    # TODO(synk): if a single image still exceeds the VMEM limit (very large
    # C*HW), tile the spatial axis with a two-sweep grid (accumulate pooled,
    # then rescale) instead of relying on one resident block.

    grid = (B // bt,)
    block_shape = block_of(bt)

    out2 = pl.pallas_call(
        functools.partial(se_block_kernel, spatial_axis=spatial_axis),
        out_shape=jax.ShapeDtypeStruct(x2.shape, x.dtype),
        grid_spec=pltpu.PrefetchScalarGridSpec(
            num_scalar_prefetch=0,
            grid=grid,
            in_specs=[
                pl.BlockSpec(block_shape, lambda i: (i, 0, 0)),
                pl.BlockSpec((C, Cr), lambda i: (0, 0)),   # W1^T, VMEM-resident
                pl.BlockSpec((1, Cr), lambda i: (0, 0)),   # b1 row
                pl.BlockSpec((Cr, C), lambda i: (0, 0)),   # W2^T, VMEM-resident
                pl.BlockSpec((1, C), lambda i: (0, 0)),    # b2 row
            ],
            out_specs=pl.BlockSpec(block_shape, lambda i: (i, 0, 0)),
        ),
        compiler_params=pltpu.CompilerParams(
            dimension_semantics=("parallel",),
            vmem_limit_bytes=vl,
        ),
    )(x2, w1t, b1r, w2t, b2r)

    if channels_on_lanes:
        return jnp.transpose(out2, (0, 2, 1)).reshape(B, C, H, W)
    return out2.reshape(B, C, H, W)


def se_block_ref(x, w1, b1, w2, b2):
    """Pure-JAX reference matching the PyTorch SEBlock forward."""
    pooled = jnp.mean(x, axis=(2, 3))                          # (B, C)
    h = jnp.maximum(pooled @ w1.T + b1, 0.0)                   # (B, Cr)
    s = jax.nn.sigmoid(h @ w2.T + b2)                          # (B, C)
    return x * s[:, :, None, None]


if __name__ == "__main__":
    key = jax.random.PRNGKey(0)

    def run_case(B, C, H, W, reduction):
        Cr = C // reduction
        kx, k1, k2, k3, k4 = jax.random.split(jax.random.fold_in(key, C * H), 5)
        x = jax.random.normal(kx, (B, C, H, W), dtype=jnp.float32)
        # nn.Linear layout: weight (out, in), bias (out,).
        w1 = jax.random.normal(k1, (Cr, C), dtype=jnp.float32) * 0.1
        b1 = jax.random.normal(k2, (Cr,), dtype=jnp.float32) * 0.1
        w2 = jax.random.normal(k3, (C, Cr), dtype=jnp.float32) * 0.1
        b2 = jax.random.normal(k4, (C,), dtype=jnp.float32) * 0.1

        out = se_block(x, w1, b1, w2, b2)
        jax.block_until_ready(out)
        ref = se_block_ref(x, w1, b1, w2, b2)
        assert out.shape == (B, C, H, W)
        assert jnp.allclose(out, ref, atol=1e-5, rtol=1e-5), \
            f"mismatch vs reference for shape {(B, C, H, W)}"

    # HW = 256 (multiple of 128): channels-on-sublanes path.
    run_case(B=2, C=64, H=16, W=16, reduction=16)
    # HW = 49 (not a 128-multiple) but C = 128: channels-on-lanes path.
    run_case(B=2, C=128, H=7, W=7, reduction=16)

    print("KERNEL_OK")
</pallas_src>

<mosaic_0001>
module attributes {stable_mosaic.version = 11 : i64} {
  func.func @se_block_kernel(%arg0: i32, %arg1: memref<1x64x256xf32, #tpu.memory_space<vmem>>, %arg2: memref<64x4xf32, #tpu.memory_space<vmem>>, %arg3: memref<1x4xf32, #tpu.memory_space<vmem>>, %arg4: memref<4x64xf32, #tpu.memory_space<vmem>>, %arg5: memref<1x64xf32, #tpu.memory_space<vmem>>, %arg6: memref<1x64x256xf32, #tpu.memory_space<vmem>>) attributes {dimension_semantics = [#tpu.dimension_semantics<parallel>], iteration_bounds = array<i64: 2>, scalar_prefetch = 0 : i64, scratch_operands = 0 : i64, tpu.core_type = #tpu.core_type<tc>, window_params = [{transform_indices = @transform_0, window_bounds = array<i64: 1, 64, 256>}, {pipeline_mode = #tpu.pipeline_mode<synchronous>, transform_indices = @transform_1, window_bounds = array<i64: 64, 4>}, {pipeline_mode = #tpu.pipeline_mode<synchronous>, transform_indices = @transform_2, window_bounds = array<i64: 1, 4>}, {pipeline_mode = #tpu.pipeline_mode<synchronous>, transform_indices = @transform_3, window_bounds = array<i64: 4, 64>}, {pipeline_mode = #tpu.pipeline_mode<synchronous>, transform_indices = @transform_4, window_bounds = array<i64: 1, 64>}, {transform_indices = @transform_5, window_bounds = array<i64: 1, 64, 256>}]} {
    %c0 = arith.constant 0 : index
    %c0_0 = arith.constant 0 : index
    %c0_1 = arith.constant 0 : index
    %0 = vector.load %arg1[%c0, %c0_0, %c0_1] : memref<1x64x256xf32, #tpu.memory_space<vmem>>, vector<1x64x256xf32>
    %cst = arith.constant dense<0.000000e+00> : vector<1x64xf32>
    %1 = vector.multi_reduction <add>, %0, %cst [2] : vector<1x64x256xf32> to vector<1x64xf32>
    %cst_2 = arith.constant 3.906250e-03 : f32
    %2 = vector.broadcast %cst_2 : f32 to vector<1x64xf32>
    %3 = arith.mulf %1, %2 : vector<1x64xf32>
    %c0_3 = arith.constant 0 : index
    %c0_4 = arith.constant 0 : index
    %4 = vector.load %arg2[%c0_3, %c0_4] : memref<64x4xf32, #tpu.memory_space<vmem>>, vector<64x4xf32>
    %cst_5 = arith.constant dense<0.000000e+00> : vector<1x4xf32>
    %5 = tpu.matmul %3, %4, %cst_5 {dimension_numbers = #tpu.dot_dimension_numbers<[1], [0], [0], [1], [0, 0, 1, 1], [], []>} : vector<1x64xf32>, vector<64x4xf32>, vector<1x4xf32> -> vector<1x4xf32>
    %c0_6 = arith.constant 0 : index
    %c0_7 = arith.constant 0 : index
    %6 = vector.load %arg3[%c0_6, %c0_7] : memref<1x4xf32, #tpu.memory_space<vmem>>, vector<1x4xf32>
    %7 = arith.addf %5, %6 : vector<1x4xf32>
    %cst_8 = arith.constant 0.000000e+00 : f32
    %8 = vector.broadcast %cst_8 : f32 to vector<1x4xf32>
    %9 = arith.maximumf %7, %8 : vector<1x4xf32>
    %c0_9 = arith.constant 0 : index
    %c0_10 = arith.constant 0 : index
    %10 = vector.load %arg4[%c0_9, %c0_10] : memref<4x64xf32, #tpu.memory_space<vmem>>, vector<4x64xf32>
    %cst_11 = arith.constant dense<0.000000e+00> : vector<1x64xf32>
    %11 = tpu.matmul %9, %10, %cst_11 {dimension_numbers = #tpu.dot_dimension_numbers<[1], [0], [0], [1], [0, 0, 1, 1], [], []>} : vector<1x4xf32>, vector<4x64xf32>, vector<1x64xf32> -> vector<1x64xf32>
    %c0_12 = arith.constant 0 : index
    %c0_13 = arith.constant 0 : index
    %12 = vector.load %arg5[%c0_12, %c0_13] : memref<1x64xf32, #tpu.memory_space<vmem>>, vector<1x64xf32>
    %13 = arith.addf %11, %12 : vector<1x64xf32>
    %14 = arith.negf %13 : vector<1x64xf32>
    %15 = math.exp %14 : vector<1x64xf32>
    %cst_14 = arith.constant 1.000000e+00 : f32
    %16 = vector.broadcast %cst_14 : f32 to vector<1x64xf32>
    %17 = arith.addf %16, %15 : vector<1x64xf32>
    %18 = arith.divf %16, %17 : vector<1x64xf32>
    %19 = vector.shape_cast %18 : vector<1x64xf32> to vector<1x64x1xf32>
    %20 = vector.broadcast %19 : vector<1x64x1xf32> to vector<1x64x256xf32>
    %21 = arith.mulf %0, %20 : vector<1x64x256xf32>
    %c0_15 = arith.constant 0 : index
    %c0_16 = arith.constant 0 : index
    %c0_17 = arith.constant 0 : index
    %22 = vector.load %arg6[%c0_15, %c0_16, %c0_17] : memref<1x64x256xf32, #tpu.memory_space<vmem>>, vector<1x64x256xf32>
    tpu.vector_store %arg6[%c0_15, %c0_16, %c0_17], %21 {strides = array<i32>} : memref<1x64x256xf32, #tpu.memory_space<vmem>>, vector<1x64x256xf32>,
    return
  }
  func.func @transform_0(%arg0: i32) -> (i32, i32, i32) {
    %c0_i32 = arith.constant 0 : i32
    %c0_i32_0 = arith.constant 0 : i32
    %c0_i32_1 = arith.constant 0 : i32
    return %arg0, %c0_i32, %c0_i32_0 : i32, i32, i32
  }
  func.func @transform_1(%arg0: i32) -> (i32, i32) {
    %c0_i32 = arith.constant 0 : i32
    %c0_i32_0 = arith.constant 0 : i32
    %c0_i32_1 = arith.constant 0 : i32
    return %c0_i32, %c0_i32_0 : i32, i32
  }
  func.func @transform_2(%arg0: i32) -> (i32, i32) {
    %c0_i32 = arith.constant 0 : i32
    %c0_i32_0 = arith.constant 0 : i32
    %c0_i32_1 = arith.constant 0 : i32
    return %c0_i32, %c0_i32_0 : i32, i32
  }
  func.func @transform_3(%arg0: i32) -> (i32, i32) {
    %c0_i32 = arith.constant 0 : i32
    %c0_i32_0 = arith.constant 0 : i32
    %c0_i32_1 = arith.constant 0 : i32
    return %c0_i32, %c0_i32_0 : i32, i32
  }
  func.func @transform_4(%arg0: i32) -> (i32, i32) {
    %c0_i32 = arith.constant 0 : i32
    %c0_i32_0 = arith.constant 0 : i32
    %c0_i32_1 = arith.constant 0 : i32
    return %c0_i32, %c0_i32_0 : i32, i32
  }
  func.func @transform_5(%arg0: i32) -> (i32, i32, i32) {
    %c0_i32 = arith.constant 0 : i32
    %c0_i32_0 = arith.constant 0 : i32
    %c0_i32_1 = arith.constant 0 : i32
    return %arg0, %c0_i32, %c0_i32_0 : i32, i32, i32
  }
}

</mosaic_0001>

<bundles_post_ra>
// kernel: tpu_custom_call.1
= control target key start
LH: loop header
LB: loop body
LE: loop exit
PB: predicated region body
PF: predicated region fallthrough
CT: control target
= control target key end

     0   :  { %10 = vsyncpa [#allocation3], 0  ;;  %s1206_s0 = inlined_call_operand.hbm [shape: f32[2,64,256], index: 0, kind: input, shape index: {}]   ;;  %s1207_s1 = inlined_call_operand.vmem [shape: f32[64,4], index: 1, kind: input, shape index: {}]   ;;  %s1208_s2 = inlined_call_operand.vmem [shape: f32[1,4], index: 2, kind: input, shape index: {}]   ;;  %s1209_s3 = inlined_call_operand.vmem [shape: f32[4,64], index: 3, kind: input, shape index: {}]   ;;  %s1210_s4 = inlined_call_operand.vmem [shape: f32[1,64], index: 4, kind: input, shape index: {}]   ;;  %s1211_s5 = inlined_call_operand.hbm [shape: f32[2,64,256], index: 5, kind: output, shape index: {}]  }
   0x1   :  { %12 = vsyncpa [#allocation3 + $0x1], 0 }
   0x2   :  { %13 = vsyncpa [#allocation4], 0 }
   0x3   :  { %15 = vsyncpa [#allocation4 + $0x1], 0  ;;  %s920_s18 = smov 0   ;;  %s922_s19 = smov 0  }
   0x4   :  { %s924_s20 = smov 0   ;;  %s926_s21 = smov 0  }
   0x5 LB: > { %s941_s22 = sadd.s32 4294967295, %s880_s21   ;;  %s677_s23 = sadd.s32 4294967294, %s880_s21   ;;  %s880_s21 = sphi %s926_s21, %s1226_s21   ;;  %s876_s20 = sphi %s924_s20, %s1225_s20   ;;  %s872_s19 = sphi %s922_s19, %s1224_s19   ;;  %s868_s18 = sphi %s920_s18, %s1223_s18  }
   0x6   : > { %s945_s24 = sadd.s32 1, %s880_s21   ;;  %s28_s25 = sadd.s32 1, %s876_s20 }
   0x7   : > { %s25_s26 = ssub.s32 %s880_s21, %s945_s24  ;;  %p35_p0 = scmp.ne.s32.totalorder %s876_s20, %s872_s19 }
   0x8   : > { %p26_p1 = scmp.eq.s32.totalorder %s25_s26, 0  ;;  %p36_p2 = scmp.eq.s32.totalorder %s880_s21, 0 }
   0x9   : > { %p41_p3 = scmp.ne.s32.totalorder %s872_s19, %s868_s18  ;;  %p42_p4 = scmp.eq.s32.totalorder %s941_s22, 0 }
   0xa   : > { %s957_s27 = scalar_select %p26_p1, %s876_s20, %s28_s25  }
   0xb   : > { %p959_p5 = por %p36_p2, %p35_p0  ;;  %p963_p6 = por %p42_p4, %p41_p3 }
   0xc   : > { %p149_p7 = scmp.eq.s32.totalorder %s941_s22, 1  ;;  %p155_p8 = scmp.eq.s32.totalorder %s677_s23, 1 }
   0xd   : > { %s1215_s29 = scalar_select %p963_p6, 1, 0 }
   0xe   : > { %p744_p10 = scmp.lt.s32.totalorder %s880_s21, 2  ;;  %p970_p11 = por %p149_p7, %p35_p0 }
   0xf   : > { %p974_p12 = por %p155_p8, %p41_p3  ;;  %s187_s7 = sand.u32 1, %s876_s20  }
  0x10   : > { %s1216_s30 = scalar_select %p970_p11, 1, 0 }
  0x11   : > { %s1217_s6 = scalar_select %p974_p12, 1, 0 }
  0x12   : > { %s695_s8 = sshll.u32 %s880_s21, 11  ;;  %s680_s9 = sshll.u32 %s187_s7, 7 }
  0x13   : > { %s983_s12 = scalar_lea.hbm %s1206_s0, %s695_s8  ;;  %s191_s13 = scalar_lea.vmem [#allocation2], %s680_s9 }
  0x14   : > { %s198_s14 = sshll.u32 %s191_s13, 4  ;;  %p987_p13 = pnand %p744_p10, %p959_p5  ;;  %s991_s14 = int_to_ptr.vmem [resolvable:$true] %s198_s14 }
  0x15   : > { %s993_s16 = scalar_lea.sflag [#allocation3], %s187_s7  ;;  %s788_s17 = scalar_lea.hbm %s983_s12, 2048 }
  0x16   : > { %p789_p0 = scmp.ne.s32.totalorder %s983_s12, %s788_s17  ;;  %p790_p1 = pneg %p987_p13 }
  0x17   : > { %s793_s26 = scalar_lea.hbm %s1206_s0, 4096  ;;  %p794_p4 = scmp.lt.s32.totalorder %s983_s12, %s1206_s0 }
  0x18   : > { %p791_p2 = pnand %p790_p1, %p789_p0  ;;  %p795_p5 = scmp.lt.s32.totalorder %s793_s26, %s788_s17 }
  0x1a   : > { %p792_p3 = pneg %p791_p2  ;;  %p796_p7 = por %p795_p5, %p794_p4 }
  0x1c   : > { %p797_p8 = pnand %p796_p7, %p792_p3 }
  0x1e   : > { %800 = shalt.err (!%p797_p8)
}
  0x1f   : > { %s801_s7 = scalar_lea.vmem %s991_s14, 2048  ;;  %s882_s9 = smov [#allocation2]  }
  0x20   : > { %p802_p10 = scmp.ne.s32.totalorder %s991_s14, %s801_s7  ;;  %s806_s10 = sshll.u32 %s882_s9, 4  ;;  %s807_s10 = int_to_ptr.vmem [resolvable:$false] %s806_s10 }
  0x21   : > { %s808_s11 = scalar_lea.vmem %s807_s10, 4096  ;;  %p809_p2 = scmp.lt.s32.totalorder %s991_s14, %s807_s10 }
  0x22   : > { %p804_p9 = pnand %p802_p10, %p790_p1  ;;  %p810_p12 = scmp.lt.s32.totalorder %s808_s11, %s801_s7 }
  0x24   : > { %p805_p0 = pneg %p804_p9  ;;  %p811_p11 = por %p810_p12, %p809_p2 }
  0x26   : > { %p812_p6 = pnand %p811_p11, %p805_p0 }
  0x28   : > { %815 = shalt.err (!%p812_p6)
}
  0x29   : > { %s883_s13 = smov 256   ;;  %s884_s17 = smov 16  }
  0x2a   : > { %739 = dma.hbm_to_vmem [thread:$0]  (!%p987_p13), %s983_s12, 2048, %s991_s14, %s993_s16, %s883_s13, %s883_s13, %s884_s17  }
  0x2b   : > { %p683_p9 = scmp.ge.s32.totalorder %s880_s21, 1  ;;  %p206_p1 = scmp.lt.s32.totalorder %s880_s21, 3 }
  0x2d   : > { %p207_p3 = pnand %p683_p9, %p206_p1 }
  0x2e   : > { %s1017_s23 = sand.u32 (!%p207_p3), 1, %s872_s19   ;;  %p1219_p6 = scmp.ne.s32.totalorder (!%p207_p3), %s1215_s29, 0 }
  0x2f   : > { %210 = sbr.rel (%p207_p3) target bundleno = 785 (0x311), region = 40  ;;  %s684_s25 = sshll.u32 (!%p207_p3), %s1017_s23, 7 }
  0x30   : > { %s213_s26 = scalar_lea.sflag (!%p207_p3), [#allocation3], %s1017_s23  ;;  %s216_s28 = scalar_lea.vmem (!%p207_p3), [#allocation2], %s684_s25 }
  0x34   : > { %859 = dma.done.wait (%p1219_p6), %s213_s26, 2048  }
  0x35   : > { %861 = vsyncadd (%p1219_p6), %s213_s26, 4294965248  ;;  %v1027_v0 = vld [vmem:[%s216_s28] sm:$0xff]  ;;  %v1029_v1 = vld [vmem:[%s216_s28 + $0x8] sm:$0xff]  ;;  %v885_v24 = vmov 0.0   ;;  %vm886_vm0 = vmmov 0   ;;  %v308_v33 = vlaneseq  ;;  %vm319_vm1 = vcmask 130112  }
  0x36   : > { %v1031_v2 = vld [vmem:[%s216_s28 + $0x20] sm:$0xff]  ;;  %v259_v3 = vadd.f32 %v1029_v1, %v1027_v0  ;;  %v1035_v4 = vld [vmem:[%s216_s28 + $0x28] sm:$0xff]  ;;  %v1037_v5 = vld [vmem:[%s216_s28 + $0x10] sm:$0xff]  ;;  %708 = vmatprep.subr.mxu0 %v885_v24  ;;  %727 = vmatprep.subr.mxu1 %v885_v24  ;;  %vm326_vm2 = vcmask 195712   ;;  %vm333_vm3 = vcmask 261312   ;;  %vm340_vm4 = vcmask 326912  }
  0x37   : > { %v1039_v6 = vld [vmem:[%s216_s28 + $0x18] sm:$0xff]  ;;  %v265_v7 = vadd.f32 %v1035_v4, %v1031_v2  ;;  %v1043_v8 = vld [vmem:[%s216_s28 + $0x30] sm:$0xff]  ;;  %v1051_v12 = vld [vmem:[%s216_s28 + $0x40] sm:$0xff]  ;;  %724 = vmatprep.mubr.msk.f32.mxu0 %vm886_vm0, %v885_v24  ;;  %729 = vmatprep.mubr.msk.f32.mxu1 %vm886_vm0, %v885_v24  ;;  %v309_v34 = vand.u32 127, %v308_v33  ;;  %v1099_v35 = vshrl.u32 %v308_v33, 7  ;;  %vm347_vm5 = vcmask 392512  }
  0x38   : > { %v1045_v9 = vld [vmem:[%s216_s28 + $0x38] sm:$0xff]  ;;  %260 = vadd.xlane.f32.xlu0 %v259_v3  ;;  %v262_v10 = vadd.f32 %v1039_v6, %v1037_v5  ;;  %v1053_v13 = vld [vmem:[%s216_s28 + $0x48] sm:$0xff]  ;;  %v1055_v14 = vld [vmem:[%s216_s28 + $0x50] sm:$0xff]  ;;  %vm354_vm6 = vcmask 458112   ;;  %vm361_vm7 = vcmask 523712   ;;  %vm363_vm8 = vcmask 523264  }
  0x39   : > { %266 = vadd.xlane.f32.xlu1 %v265_v7  ;;  %v268_v11 = vadd.f32 %v1045_v9, %v1043_v8  ;;  %v1057_v15 = vld [vmem:[%s216_s28 + $0x58] sm:$0xff]  ;;  %v271_v16 = vadd.f32 %v1053_v13, %v1051_v12  ;;  %v1063_v18 = vld [vmem:[%s216_s28 + $0x60] sm:$0xff]  ;;  %v1065_v19 = vld [vmem:[%s216_s28 + $0x68] sm:$0xff]  ;;  %v314_v36 = vadd.s32 4294967288, %v309_v34  ;;  %v321_v38 = vadd.s32 4294967280, %v309_v34  ;;  %s1126_s10 = scalar_lea.vmem [#allocation5], %s684_s25 }
  0x3a   : > { %v274_v17 = vadd.f32 %v1057_v15, %v1055_v14  ;;  %v1067_v20 = vld [vmem:[%s216_s28 + $0x70] sm:$0xff]  ;;  %v1069_v21 = vld [vmem:[%s216_s28 + $0x78] sm:$0xff]  ;;  %v277_v22 = vadd.f32 %v1065_v19, %v1063_v18  ;;  %v296_v27 = vld [vmem:[%s1207_s1 + $0x28] sm:$0xff]  ;;  %v328_v39 = vadd.s32 4294967272, %v309_v34  ;;  %v312_v41 = vsub.s32 %v309_v34, %v1099_v35  ;;  %s696_s25 = sshll.u32 %s941_s22, 11  ;;  %s604_s11 = sshll.u32 %s1126_s10, 4  ;;  %s1159_s11 = int_to_ptr.vmem [resolvable:$true] %s604_s11 }
  0x3b   : > { %v280_v23 = vadd.f32 %v1069_v21, %v1067_v20  ;;  %v298_v25 = vld [vmem:[%s1207_s1 + $0x38] sm:$0xff]  ;;  %v297_v26 = vld [vmem:[%s1207_s1 + $0x30] sm:$0xff]  ;;  %v295_v28 = vld [vmem:[%s1207_s1 + $0x20] sm:$0xff]  ;;  %v317_v43 = vsub.s32 %v314_v36, %v1099_v35  ;;  %v335_v44 = vadd.s32 4294967264, %v309_v34  ;;  %v324_v45 = vsub.s32 %v321_v38, %v1099_v35  ;;  %s1157_s26 = scalar_lea.hbm %s1211_s5, %s696_s25  ;;  %s591_s22 = scalar_lea.sflag [#allocation4], %s1017_s23 }
  0x3c   : > { %263 = vadd.xlane.f32.xlu0 %v262_v10  ;;  %709 = vmatpush3.msra.mxu0 %v298_v25  ;;  %v294_v29 = vld [vmem:[%s1207_s1 + $0x18] sm:$0xff]  ;;  %v293_v30 = vld [vmem:[%s1207_s1 + $0x10] sm:$0xff]  ;;  %v292_v31 = vld [vmem:[%s1207_s1 + $0x8] sm:$0xff]  ;;  %v331_v48 = vsub.s32 %v328_v39, %v1099_v35  ;;  %v342_v49 = vadd.s32 4294967256, %v309_v34  ;;  %v349_v56 = vadd.s32 4294967248, %v309_v34  ;;  %v356_v61 = vadd.s32 4294967240, %v309_v34 }
  0x3d   : > { %269 = vadd.xlane.f32.xlu1 %v268_v11  ;;  %710 = vmatprep.subr.mxu0 %v885_v24  ;;  %v291_v32 = vld [vmem:[%s1207_s1] sm:$0xff]  ;;  %v338_v55 = vsub.s32 %v335_v44, %v1099_v35  ;;  %vm443_vm9 = vcmask 1043456   ;;  %vm439_vm10 = vcmask 31744   ;;  %s816_s28 = scalar_lea.vmem %s1159_s11, 2048  ;;  %p1220_p12 = scmp.ne.s32.totalorder %s1216_s30, 0 }
  0x3e   : > { %711 = vmatpush3.msra.mxu0 %v297_v26  ;;  %v345_v60 = vsub.s32 %v342_v49, %v1099_v35  ;;  %v437_v34 = vld [vmem:[%s1209_s3] sm:$0xf]  ;;  %p817_p11 = scmp.ne.s32.totalorder %s1159_s11, %s816_s28  ;;  %s887_s29 = smov [#allocation5]  }
  0x3f   : > { %712 = vmatprep.subr.mxu0 %v885_v24  ;;  %728 = vmatpush3.msk.msra.mxu1 %vm443_vm9, %v437_v34  ;;  %v299_v36 = vld [vmem:[%s1208_s2] sm:$0x1]  ;;  %s820_s12 = sshll.u32 %s887_s29, 4  ;;  %s821_s12 = int_to_ptr.vmem [resolvable:$false] %s820_s12 }
  0x40   : > { %272 = vadd.xlane.f32.xlu0 %v271_v16  ;;  %713 = vmatpush3.msra.mxu0 %v296_v27  ;;  %p818_p13 = pnand %p817_p11, %p1220_p12  ;;  %s822_s14 = scalar_lea.vmem %s821_s12, 4096 }
  0x41   : > { %275 = vadd.xlane.f32.xlu1 %v274_v17  ;;  %714 = vmatprep.subr.mxu0 %v885_v24  ;;  %v352_v17 = vsub.s32 %v349_v56, %v1099_v35  ;;  %p823_p5 = scmp.lt.s32.totalorder %s1159_s11, %s821_s12  ;;  %p824_p7 = scmp.lt.s32.totalorder %s822_s14, %s816_s28 }
  0x42   : > { %715 = vmatpush3.msra.mxu0 %v295_v28  ;;  %p819_p4 = pneg %p818_p13 }
  0x43   : > { %716 = vmatprep.subr.mxu0 %v885_v24  ;;  %p825_p8 = por %p824_p7, %p823_p5 }
  0x44   : > { %278 = vadd.xlane.f32.xlu0 %v277_v22  ;;  %717 = vmatpush3.msra.mxu0 %v294_v29 }
  0x45   : > { %281 = vadd.xlane.f32.xlu1 %v280_v23  ;;  %718 = vmatprep.subr.mxu0 %v885_v24  ;;  %p826_p10 = pnand %p825_p8, %p819_p4 }
  0x46   : > { %719 = vmatpush3.msra.mxu0 %v293_v30 }
  0x47   : > { %720 = vmatprep.subr.mxu0 %v885_v24 }
  0x48   : > { %721 = vmatpush3.msra.mxu0 %v292_v31 }
  0x49   : > { %722 = vmatprep.subr.mxu0 %v885_v24  ;;  %v359_v24 = vsub.s32 %v356_v61, %v1099_v35 }
  0x4a   : > { %723 = vmatpush3.msra.mxu0 %v291_v32 }
  0xc1   : > { %v261_v37 = vpop.xlane.xlu0 %260 }
  0xc2   : > { %v267_v40 = vpop.xlane.xlu1 %266  ;;  %v283_v42 = vmul.f32 0.00390625, %v261_v37 }
  0xc3   : > { %v285_v46 = vmul.f32 0.00390625, %v267_v40 }
  0xc4   : > { %v313_v53 = vrot.slane %v283_v42, %v312_v41  ;;  %v438_v41 = vld [vmem:[%s1210_s4] sm:$0x1] }
  0xc5   : > { %v264_v47 = vpop.xlane.xlu0 %263  ;;  %v325_v57 = vrot.slane %v285_v46, %v324_v45 }
  0xc6   : > { %v284_v50 = vmul.f32 0.00390625, %v264_v47  ;;  %v270_v51 = vpop.xlane.xlu1 %269 }
  0xc7   : > { %v286_v52 = vmul.f32 0.00390625, %v270_v51 }
  0xc8   : > { %v318_v54 = vrot.slane %v284_v50, %v317_v43 }
  0xc9   : > { %v332_v58 = vrot.slane %v286_v52, %v331_v48  ;;  %v273_v59 = vpop.xlane.xlu0 %272  ;;  %v525_v48 = vsub.s32 0, %v1099_v35 }
  0xca   : > { %v320_v62 = vsel %vm319_vm1, %v318_v54, %v313_v53  ;;  %v287_v63 = vmul.f32 0.00390625, %v273_v59  ;;  %v276_v3 = vpop.xlane.xlu1 %275 }
  0xcb   : > { %v327_v7 = vsel %vm326_vm2, %v325_v57, %v320_v62  ;;  %v288_v10 = vmul.f32 0.00390625, %v276_v3 }
  0xcc   : > { %v334_v11 = vsel %vm333_vm3, %v332_v58, %v327_v7  ;;  %v339_v16 = vrot.slane %v287_v63, %v338_v55 }
  0xcd   : > { %v346_v22 = vrot.slane %v288_v10, %v345_v60  ;;  %v279_v23 = vpop.xlane.xlu0 %278 }
  0xce   : > { %v341_v25 = vsel %vm340_vm4, %v339_v16, %v334_v11  ;;  %v289_v26 = vmul.f32 0.00390625, %v279_v23  ;;  %v282_v27 = vpop.xlane.xlu1 %281 }
  0xcf   : > { %v290_v28 = vmul.f32 0.00390625, %v282_v27  ;;  %v348_v30 = vsel %vm347_vm5, %v346_v22, %v341_v25 }
  0xd0   : > { %v353_v29 = vrot.slane %v289_v26, %v352_v17 }
  0xd1   : > { %v360_v31 = vrot.slane %v290_v28, %v359_v24 }
  0xd2   : > { %v355_v32 = vsel %vm354_vm6, %v353_v29, %v348_v30 }
  0xd3   : > { %v362_v33 = vsel %vm361_vm7, %v360_v31, %v355_v32 }
  0xd4   : > { %725 = vmatmul.mubr.msk.f32.vlgmr.msra.gmra.mxu0 %vm363_vm8, %v362_v33 }
 0x194   : > { %v432_v37 = vpop.f32.mrf.mxu0 }
 0x195   : > { %v433_v38 = vadd.f32 %v432_v37, %v299_v36 }
 0x196   : > { %v726_v39 = vpop.f32.mrf.mxu0 }
 0x197   : > { %v436_v40 = vmax.f32 %v433_v38, 0.0 }
 0x199   : > { %730 = vmatmul.mubr.msk.f32.vlgmr.msra.gmra.mxu1 %vm439_vm10, %v436_v40 }
 0x259   : > { %v513_v42 = vpop.f32.mrf.mxu1 }
 0x25a   : > { %v514_v43 = vadd.f32 %v513_v42, %v438_v41 }
 0x25b   : > { %v731_v44 = vpop.f32.mrf.mxu1 }
 0x25c   : > { %v689_v45 = vmul.f32 -1.442695, %v514_v43 }
 0x25e   : > { %784 = vpow2.f32 %v689_v45 }
 0x26b   : > { %v785_v46 = vpop.eup %784 }
 0x26c   : > { %v520_v47 = vadd.f32 1.0, %v785_v46 }
 0x26e   : > { %786 = vrcp.f32 %v520_v47 }
 0x27b   : > { %v787_v49 = vpop.eup %786 }
 0x27c   : > { %v526_v50 = vrot.slane %v787_v49, %v525_v48 }
 0x27e   : > { %532 = vbcast.lane.b32.xlu1 %v526_v50, 264  ;;  %528 = vbcast.lane.b32.xlu0 %v526_v50, 256 }
 0x282   : > { %536 = vbcast.lane.b32.xlu1 %v526_v50, 272  ;;  %544 = vbcast.lane.b32.xlu0 %v526_v50, 288 }
 0x286   : > { %540 = vbcast.lane.b32.xlu1 %v526_v50, 280  ;;  %552 = vbcast.lane.b32.xlu0 %v526_v50, 304 }
 0x28a   : > { %548 = vbcast.lane.b32.xlu1 %v526_v50, 296 }
 0x28e   : > { %556 = vbcast.lane.b32.xlu1 %v526_v50, 312 }
 0x2f0   : > { %v533_v51 = vpop.permute.xlu1 %532  ;;  %v529_v52 = vpop.permute.xlu0 %528 }
 0x2f1   : > { %v560_v53 = vmul.f32 %v533_v51, %v1037_v5  ;;  %v561_v54 = vmul.f32 %v533_v51, %v1039_v6  ;;  %v558_v55 = vmul.f32 %v529_v52, %v1027_v0  ;;  %v559_v35 = vmul.f32 %v529_v52, %v1029_v1 }
 0x2f3   : > { %576 = vst [vmem:[%s1126_s10 + $0x10] sm:$0xff] %v560_v53  ;;  %577 = vst [vmem:[%s1126_s10 + $0x18] sm:$0xff] %v561_v54 }
 0x2f4   : > { %574 = vst [vmem:[%s1126_s10] sm:$0xff] %v558_v55  ;;  %575 = vst [vmem:[%s1126_s10 + $0x8] sm:$0xff] %v559_v35  ;;  %v537_v5 = vpop.permute.xlu1 %536  ;;  %v545_v0 = vpop.permute.xlu0 %544 }
 0x2f5   : > { %v562_v1 = vmul.f32 %v537_v5, %v1031_v2  ;;  %v563_v6 = vmul.f32 %v537_v5, %v1035_v4  ;;  %v566_v56 = vmul.f32 %v545_v0, %v1051_v12  ;;  %v567_v57 = vmul.f32 %v545_v0, %v1053_v13 }
 0x2f7   : > { %578 = vst [vmem:[%s1126_s10 + $0x20] sm:$0xff] %v562_v1  ;;  %579 = vst [vmem:[%s1126_s10 + $0x28] sm:$0xff] %v563_v6 }
 0x2f8   : > { %582 = vst [vmem:[%s1126_s10 + $0x40] sm:$0xff] %v566_v56  ;;  %583 = vst [vmem:[%s1126_s10 + $0x48] sm:$0xff] %v567_v57  ;;  %v541_v58 = vpop.permute.xlu1 %540  ;;  %v553_v59 = vpop.permute.xlu0 %552 }
 0x2f9   : > { %v564_v2 = vmul.f32 %v541_v58, %v1043_v8  ;;  %v565_v60 = vmul.f32 %v541_v58, %v1045_v9  ;;  %v570_v4 = vmul.f32 %v553_v59, %v1063_v18  ;;  %v571_v12 = vmul.f32 %v553_v59, %v1065_v19 }
 0x2fb   : > { %580 = vst [vmem:[%s1126_s10 + $0x30] sm:$0xff] %v564_v2  ;;  %581 = vst [vmem:[%s1126_s10 + $0x38] sm:$0xff] %v565_v60 }
 0x2fc   : > { %586 = vst [vmem:[%s1126_s10 + $0x60] sm:$0xff] %v570_v4  ;;  %587 = vst [vmem:[%s1126_s10 + $0x68] sm:$0xff] %v571_v12  ;;  %v549_v13 = vpop.permute.xlu1 %548 }
 0x2fd   : > { %v568_v61 = vmul.f32 %v549_v13, %v1055_v14  ;;  %v569_v62 = vmul.f32 %v549_v13, %v1057_v15 }
 0x2ff   : > { %584 = vst [vmem:[%s1126_s10 + $0x50] sm:$0xff] %v568_v61  ;;  %585 = vst [vmem:[%s1126_s10 + $0x58] sm:$0xff] %v569_v62 }
 0x300   : > { %v557_v8 = vpop.permute.xlu1 %556 }
 0x301   : > { %v572_v9 = vmul.f32 %v557_v8, %v1067_v20  ;;  %v573_v14 = vmul.f32 %v557_v8, %v1069_v21 }
 0x303   : > { %588 = vst [vmem:[%s1126_s10 + $0x70] sm:$0xff] %v572_v9  ;;  %589 = vst [vmem:[%s1126_s10 + $0x78] sm:$0xff] %v573_v14 }
 0x304   : > { %829 = shalt.err (!%p826_p10)
}
 0x305   : > { %s830_s15 = scalar_lea.hbm %s1157_s26, 2048  ;;  %s834_s7 = scalar_lea.hbm %s1211_s5, 4096 }
 0x306   : > { %p831_p0 = scmp.ne.s32.totalorder %s1157_s26, %s830_s15  ;;  %p835_p1 = scmp.lt.s32.totalorder %s1157_s26, %s1211_s5 }
 0x307   : > { %p836_p3 = scmp.lt.s32.totalorder %s834_s7, %s830_s15 }
 0x308   : > { %p832_p2 = pnand %p831_p0, %p1220_p12 }
 0x309   : > { %p837_p6 = por %p836_p3, %p835_p1 }
 0x30a   : > { %p833_p9 = pneg %p832_p2 }
 0x30c   : > { %p838_p11 = pnand %p837_p6, %p833_p9 }
 0x30e   : > { %841 = shalt.err (!%p838_p11)
}
 0x30f   : > { %s888_s25 = smov 256   ;;  %s889_s13 = smov 16  }
 0x310   : > { %734 = dma.vmem_to_hbm [thread:$0]  (%p1220_p12), %s1159_s11, 2048, %s1157_s26, %s591_s22, %s888_s25, %s888_s25, %s889_s13  }
 0x311 PF: > { %s619_s17 = sand.u32 1, %s868_s18   ;;  %p1221_p13 = scmp.ne.s32.totalorder %s1217_s6, 0 }
 0x312   : > { %p1222_p4 = scmp.ge.s32.totalorder %s880_s21, 2  ;;  %s620_s28 = scalar_lea.sflag [#allocation4], %s619_s17 }
 0x314   : > { %p741_p5 = pnand %p1222_p4, %p1221_p13 }
 0x316   : > { %p742_p7 = pneg %p741_p5 }
 0x318   : > { %863 = dma.done.wait (%p742_p7), %s620_s28, 2048  }
 0x319   : > { %865 = vsyncadd (%p742_p7), %s620_s28, 4294965248  ;;  %p18_p8 = scmp.ge.s32.totalorder %s945_s24, 4   ;;  %s1223_s18 = smov %s872_s19 }
 0x31a   : > { %s1224_s19 = smov %s876_s20  ;;  %s1225_s20 = smov %s957_s27 }
 0x31b   : > { %s1226_s21 = smov %s945_s24  ;;  %20 = sbr.rel (!%p18_p8) target bundleno = 5 (0x5), region = 85 }
 0x320   :  { %625 = vsyncpa [#allocation3], 1 }
 0x321   :  { %627 = vsyncpa [#allocation3 + $0x1], 1 }
 0x322   :  { %628 = vsyncpa [#allocation4], 1 }
 0x323   :  { %630 = vsyncpa [#allocation4 + $0x1], 1 }

</bundles_post_ra>
